<compile_context>
chip_gen: v7x
topology: tpu7x:2x2x1
jax: 0.10.0
libtpu: 0.0.40
codegen_flags: <defaults>
</compile_context>

<pallas_src>
import math

import jax
import jax.numpy as jnp
from jax.experimental import pallas as pl
from jax.experimental.pallas import tpu as pltpu


def _attention_kernel(x_ref, w_ref, b_ref, o_ref, e_scr):
    # x_ref: (Bt, T, F); w_ref: (1, F); b_ref: (1, T); o_ref: (Bt, F); e_scr: (Bt, T)
    T = x_ref.shape[1]
    w = w_ref[...]                                            # (1, F)

    # Scores: e_scr[:, t] = sum_f x[:, t, f] * w[f]  (VPU multiply + lane reduce).
    for t in range(T):
        xt = x_ref[:, t, :]                                   # (Bt, F)
        e_scr[:, t : t + 1] = jnp.sum(
            xt * w, axis=-1, keepdims=True
        ).astype(jnp.float32)

    # a = exp(tanh(scores + bias)); normalize (divide first, then +1e-10, as in torch).
    scores = e_scr[...] + b_ref[...]                          # (Bt, T)
    a = jnp.exp(jnp.tanh(scores))                             # (Bt, T)
    denom = jnp.sum(a, axis=-1, keepdims=True)                # (Bt, 1)
    a = a * pl.reciprocal(denom, approx=True) + 1e-10         # (Bt, T)

    # Weighted sum over the step dimension (pure VPU accumulation).
    acc = x_ref[:, 0, :] * a[:, 0:1]                          # (Bt, F)
    for t in range(1, T):
        acc = acc + x_ref[:, t, :] * a[:, t : t + 1]
    o_ref[...] = acc.astype(o_ref.dtype)


def _round_up(x, m):
    return ((x + m - 1) // m) * m


def _choose_block_rows(B, T, F, vmem_budget_bytes=12 * 1024 * 1024):
    """Rows per block so double-buffered tiles stay inside a conservative VMEM
    budget on every TPU generation (v7x only has 64 MiB physical VMEM)."""
    f_pad = _round_up(F, 128)            # lane padding of the feature dim
    t_pad = _round_up(T, 8)              # sublane padding of the step dim
    bytes_per_row = 4 * (
        2 * t_pad * f_pad                # x block, double buffered (lane-padded)
        + 2 * f_pad                      # output block, double buffered
        + _round_up(T, 128)              # score scratch
    )
    bt = max(8, (vmem_budget_bytes // bytes_per_row) // 8 * 8)
    b_pad = _round_up(B, 8)
    bt = min(bt, b_pad)
    # Keep >= ~8 grid steps on large batches so both v7x TensorCores (and the
    # software pipeline) stay busy.
    min_steps = 8
    if b_pad > bt and -(-b_pad // bt) < min_steps:
        bt = max(8, _round_up(-(-b_pad // min_steps), 8))
    return bt


def attention_forward(x, weight, bias, *, block_rows=None):
    """x: (B, T, F), weight: (F, 1) or (F,), bias: (T,) -> (B, F)."""
    B, T, F = x.shape
    bt = _choose_block_rows(B, T, F) if block_rows is None else block_rows
    b_pad = _round_up(B, bt)
    if b_pad != B:
        # Zero padding is safe: padded rows give finite garbage that is sliced off.
        x = jnp.pad(x, ((0, b_pad - B), (0, 0), (0, 0)))

    w_row = weight.reshape(1, F).astype(x.dtype)
    b_row = bias.reshape(1, T).astype(jnp.float32)

    out = pl.pallas_call(
        _attention_kernel,
        out_shape=jax.ShapeDtypeStruct((b_pad, F), x.dtype),
        grid_spec=pltpu.PrefetchScalarGridSpec(
            num_scalar_prefetch=0,
            grid=(b_pad // bt,),
            in_specs=[
                pl.BlockSpec((bt, T, F), lambda i: (i, 0, 0)),   # x rows
                pl.BlockSpec((1, F), lambda i: (0, 0)),          # weight (resident)
                pl.BlockSpec((1, T), lambda i: (0, 0)),          # bias (resident)
            ],
            out_specs=pl.BlockSpec((bt, F), lambda i: (i, 0)),
            scratch_shapes=[pltpu.VMEM((bt, T), jnp.float32)],
        ),
        compiler_params=pltpu.CompilerParams(
            dimension_semantics=("parallel",),
            vmem_limit_bytes=32 * 1024 * 1024,
        ),
        cost_estimate=pl.CostEstimate(
            flops=4 * b_pad * T * F,
            transcendentals=2 * b_pad * T,
            bytes_accessed=4 * (b_pad * T * F + b_pad * F + F + T),
        ),
    )(x, w_row, b_row)
    return out[:B]


def _reference(x, weight, bias):
    B, T, F = x.shape
    eij = (x.reshape(-1, F) @ weight.reshape(F, 1)).reshape(B, T) + bias[None, :]
    eij = jnp.tanh(eij)
    a = jnp.exp(eij)
    a = a / jnp.sum(a, axis=1, keepdims=True) + 1e-10
    return jnp.sum(x * a[..., None], axis=1)


if __name__ == "__main__":
    # Shapes implied by the module: x (batch, step_dim, feature_dim)
    batch, step_dim, feature_dim = 2, 8, 32

    key = jax.random.PRNGKey(0)
    kx, kw = jax.random.split(key)

    x = jax.random.normal(kx, (batch, step_dim, feature_dim), dtype=jnp.float32)

    # Deterministic xavier_uniform_ init for weight (feature_dim, 1)
    bound = math.sqrt(6.0 / (feature_dim + 1))
    weight = jax.random.uniform(
        kw, (feature_dim, 1), dtype=jnp.float32, minval=-bound, maxval=bound
    )
    # bias initialized to zeros, same as the PyTorch module
    bias = jnp.zeros((step_dim,), dtype=jnp.float32)

    out = jax.block_until_ready(attention_forward(x, weight, bias))
    ref = _reference(x, weight, bias)

    assert out.shape == (batch, feature_dim)
    # approx=True reciprocal (EUP) => slightly looser tolerance than exact f32
    assert jnp.allclose(out, ref, atol=2e-3, rtol=2e-3), "mismatch vs reference"

    print("KERNEL_OK")
</pallas_src>

<mosaic_0001>
module attributes {stable_mosaic.version = 11 : i64} {
  func.func @_attention_kernel(%arg0: i32, %arg1: memref<8x8x32xf32, #tpu.memory_space<vmem>>, %arg2: memref<1x32xf32, #tpu.memory_space<vmem>>, %arg3: memref<1x8xf32, #tpu.memory_space<vmem>>, %arg4: memref<8x32xf32, #tpu.memory_space<vmem>>, %arg5: memref<8x8xf32, #tpu.memory_space<vmem>>) attributes {dimension_semantics = [#tpu.dimension_semantics<parallel>], iteration_bounds = array<i64: 1>, scalar_prefetch = 0 : i64, scratch_operands = 1 : i64, tpu.core_type = #tpu.core_type<tc>, window_params = [{transform_indices = @transform_0, window_bounds = array<i64: 8, 8, 32>}, {pipeline_mode = #tpu.pipeline_mode<synchronous>, transform_indices = @transform_1, window_bounds = array<i64: 1, 32>}, {pipeline_mode = #tpu.pipeline_mode<synchronous>, transform_indices = @transform_2, window_bounds = array<i64: 1, 8>}, {transform_indices = @transform_3, window_bounds = array<i64: 8, 32>}]} {
    %c0 = arith.constant 0 : index
    %c0_0 = arith.constant 0 : index
    %0 = vector.load %arg2[%c0, %c0_0] : memref<1x32xf32, #tpu.memory_space<vmem>>, vector<1x32xf32>
    %c0_1 = arith.constant 0 : index
    %c0_2 = arith.constant 0 : index
    %c0_3 = arith.constant 0 : index
    %1 = vector.load %arg1[%c0_1, %c0_2, %c0_3] : memref<8x8x32xf32, #tpu.memory_space<vmem>>, vector<8x1x32xf32>
    %2 = vector.shape_cast %1 : vector<8x1x32xf32> to vector<8x32xf32>
    %3 = vector.broadcast %0 : vector<1x32xf32> to vector<8x32xf32>
    %4 = arith.mulf %2, %3 : vector<8x32xf32>
    %cst = arith.constant dense<0.000000e+00> : vector<8xf32>
    %5 = vector.multi_reduction <add>, %4, %cst [1] : vector<8x32xf32> to vector<8xf32>
    %6 = vector.shape_cast %5 : vector<8xf32> to vector<8x1xf32>
    %c0_4 = arith.constant 0 : index
    %c0_5 = arith.constant 0 : index
    %7 = vector.load %arg5[%c0_4, %c0_5] : memref<8x8xf32, #tpu.memory_space<vmem>>, vector<8x1xf32>
    tpu.vector_store %arg5[%c0_4, %c0_5], %6 {strides = array<i32>} : memref<8x8xf32, #tpu.memory_space<vmem>>, vector<8x1xf32>,
    %c0_6 = arith.constant 0 : index
    %c1 = arith.constant 1 : index
    %c0_7 = arith.constant 0 : index
    %8 = vector.load %arg1[%c0_6, %c1, %c0_7] : memref<8x8x32xf32, #tpu.memory_space<vmem>>, vector<8x1x32xf32>
    %9 = vector.shape_cast %8 : vector<8x1x32xf32> to vector<8x32xf32>
    %10 = vector.broadcast %0 : vector<1x32xf32> to vector<8x32xf32>
    %11 = arith.mulf %9, %10 : vector<8x32xf32>
    %cst_8 = arith.constant dense<0.000000e+00> : vector<8xf32>
    %12 = vector.multi_reduction <add>, %11, %cst_8 [1] : vector<8x32xf32> to vector<8xf32>
    %13 = vector.shape_cast %12 : vector<8xf32> to vector<8x1xf32>
    %c0_9 = arith.constant 0 : index
    %c1_10 = arith.constant 1 : index
    %14 = vector.load %arg5[%c0_9, %c1_10] : memref<8x8xf32, #tpu.memory_space<vmem>>, vector<8x1xf32>
    tpu.vector_store %arg5[%c0_9, %c1_10], %13 {strides = array<i32>} : memref<8x8xf32, #tpu.memory_space<vmem>>, vector<8x1xf32>,
    %c0_11 = arith.constant 0 : index
    %c2 = arith.constant 2 : index
    %c0_12 = arith.constant 0 : index
    %15 = vector.load %arg1[%c0_11, %c2, %c0_12] : memref<8x8x32xf32, #tpu.memory_space<vmem>>, vector<8x1x32xf32>
    %16 = vector.shape_cast %15 : vector<8x1x32xf32> to vector<8x32xf32>
    %17 = vector.broadcast %0 : vector<1x32xf32> to vector<8x32xf32>
    %18 = arith.mulf %16, %17 : vector<8x32xf32>
    %cst_13 = arith.constant dense<0.000000e+00> : vector<8xf32>
    %19 = vector.multi_reduction <add>, %18, %cst_13 [1] : vector<8x32xf32> to vector<8xf32>
    %20 = vector.shape_cast %19 : vector<8xf32> to vector<8x1xf32>
    %c0_14 = arith.constant 0 : index
    %c2_15 = arith.constant 2 : index
    %21 = vector.load %arg5[%c0_14, %c2_15] : memref<8x8xf32, #tpu.memory_space<vmem>>, vector<8x1xf32>
    tpu.vector_store %arg5[%c0_14, %c2_15], %20 {strides = array<i32>} : memref<8x8xf32, #tpu.memory_space<vmem>>, vector<8x1xf32>,
    %c0_16 = arith.constant 0 : index
    %c3 = arith.constant 3 : index
    %c0_17 = arith.constant 0 : index
    %22 = vector.load %arg1[%c0_16, %c3, %c0_17] : memref<8x8x32xf32, #tpu.memory_space<vmem>>, vector<8x1x32xf32>
    %23 = vector.shape_cast %22 : vector<8x1x32xf32> to vector<8x32xf32>
    %24 = vector.broadcast %0 : vector<1x32xf32> to vector<8x32xf32>
    %25 = arith.mulf %23, %24 : vector<8x32xf32>
    %cst_18 = arith.constant dense<0.000000e+00> : vector<8xf32>
    %26 = vector.multi_reduction <add>, %25, %cst_18 [1] : vector<8x32xf32> to vector<8xf32>
    %27 = vector.shape_cast %26 : vector<8xf32> to vector<8x1xf32>
    %c0_19 = arith.constant 0 : index
    %c3_20 = arith.constant 3 : index
    %28 = vector.load %arg5[%c0_19, %c3_20] : memref<8x8xf32, #tpu.memory_space<vmem>>, vector<8x1xf32>
    tpu.vector_store %arg5[%c0_19, %c3_20], %27 {strides = array<i32>} : memref<8x8xf32, #tpu.memory_space<vmem>>, vector<8x1xf32>,
    %c0_21 = arith.constant 0 : index
    %c4 = arith.constant 4 : index
    %c0_22 = arith.constant 0 : index
    %29 = vector.load %arg1[%c0_21, %c4, %c0_22] : memref<8x8x32xf32, #tpu.memory_space<vmem>>, vector<8x1x32xf32>
    %30 = vector.shape_cast %29 : vector<8x1x32xf32> to vector<8x32xf32>
    %31 = vector.broadcast %0 : vector<1x32xf32> to vector<8x32xf32>
    %32 = arith.mulf %30, %31 : vector<8x32xf32>
    %cst_23 = arith.constant dense<0.000000e+00> : vector<8xf32>
    %33 = vector.multi_reduction <add>, %32, %cst_23 [1] : vector<8x32xf32> to vector<8xf32>
    %34 = vector.shape_cast %33 : vector<8xf32> to vector<8x1xf32>
    %c0_24 = arith.constant 0 : index
    %c4_25 = arith.constant 4 : index
    %35 = vector.load %arg5[%c0_24, %c4_25] : memref<8x8xf32, #tpu.memory_space<vmem>>, vector<8x1xf32>
    tpu.vector_store %arg5[%c0_24, %c4_25], %34 {strides = array<i32>} : memref<8x8xf32, #tpu.memory_space<vmem>>, vector<8x1xf32>,
    %c0_26 = arith.constant 0 : index
    %c5 = arith.constant 5 : index
    %c0_27 = arith.constant 0 : index
    %36 = vector.load %arg1[%c0_26, %c5, %c0_27] : memref<8x8x32xf32, #tpu.memory_space<vmem>>, vector<8x1x32xf32>
    %37 = vector.shape_cast %36 : vector<8x1x32xf32> to vector<8x32xf32>
    %38 = vector.broadcast %0 : vector<1x32xf32> to vector<8x32xf32>
    %39 = arith.mulf %37, %38 : vector<8x32xf32>
    %cst_28 = arith.constant dense<0.000000e+00> : vector<8xf32>
    %40 = vector.multi_reduction <add>, %39, %cst_28 [1] : vector<8x32xf32> to vector<8xf32>
    %41 = vector.shape_cast %40 : vector<8xf32> to vector<8x1xf32>
    %c0_29 = arith.constant 0 : index
    %c5_30 = arith.constant 5 : index
    %42 = vector.load %arg5[%c0_29, %c5_30] : memref<8x8xf32, #tpu.memory_space<vmem>>, vector<8x1xf32>
    tpu.vector_store %arg5[%c0_29, %c5_30], %41 {strides = array<i32>} : memref<8x8xf32, #tpu.memory_space<vmem>>, vector<8x1xf32>,
    %c0_31 = arith.constant 0 : index
    %c6 = arith.constant 6 : index
    %c0_32 = arith.constant 0 : index
    %43 = vector.load %arg1[%c0_31, %c6, %c0_32] : memref<8x8x32xf32, #tpu.memory_space<vmem>>, vector<8x1x32xf32>
    %44 = vector.shape_cast %43 : vector<8x1x32xf32> to vector<8x32xf32>
    %45 = vector.broadcast %0 : vector<1x32xf32> to vector<8x32xf32>
    %46 = arith.mulf %44, %45 : vector<8x32xf32>
    %cst_33 = arith.constant dense<0.000000e+00> : vector<8xf32>
    %47 = vector.multi_reduction <add>, %46, %cst_33 [1] : vector<8x32xf32> to vector<8xf32>
    %48 = vector.shape_cast %47 : vector<8xf32> to vector<8x1xf32>
    %c0_34 = arith.constant 0 : index
    %c6_35 = arith.constant 6 : index
    %49 = vector.load %arg5[%c0_34, %c6_35] : memref<8x8xf32, #tpu.memory_space<vmem>>, vector<8x1xf32>
    tpu.vector_store %arg5[%c0_34, %c6_35], %48 {strides = array<i32>} : memref<8x8xf32, #tpu.memory_space<vmem>>, vector<8x1xf32>,
    %c0_36 = arith.constant 0 : index
    %c7 = arith.constant 7 : index
    %c0_37 = arith.constant 0 : index
    %50 = vector.load %arg1[%c0_36, %c7, %c0_37] : memref<8x8x32xf32, #tpu.memory_space<vmem>>, vector<8x1x32xf32>
    %51 = vector.shape_cast %50 : vector<8x1x32xf32> to vector<8x32xf32>
    %52 = vector.broadcast %0 : vector<1x32xf32> to vector<8x32xf32>
    %53 = arith.mulf %51, %52 : vector<8x32xf32>
    %cst_38 = arith.constant dense<0.000000e+00> : vector<8xf32>
    %54 = vector.multi_reduction <add>, %53, %cst_38 [1] : vector<8x32xf32> to vector<8xf32>
    %55 = vector.shape_cast %54 : vector<8xf32> to vector<8x1xf32>
    %c0_39 = arith.constant 0 : index
    %c7_40 = arith.constant 7 : index
    %56 = vector.load %arg5[%c0_39, %c7_40] : memref<8x8xf32, #tpu.memory_space<vmem>>, vector<8x1xf32>
    tpu.vector_store %arg5[%c0_39, %c7_40], %55 {strides = array<i32>} : memref<8x8xf32, #tpu.memory_space<vmem>>, vector<8x1xf32>,
    %c0_41 = arith.constant 0 : index
    %c0_42 = arith.constant 0 : index
    %57 = vector.load %arg5[%c0_41, %c0_42] : memref<8x8xf32, #tpu.memory_space<vmem>>, vector<8x8xf32>
    %c0_43 = arith.constant 0 : index
    %c0_44 = arith.constant 0 : index
    %58 = vector.load %arg3[%c0_43, %c0_44] : memref<1x8xf32, #tpu.memory_space<vmem>>, vector<1x8xf32>
    %59 = vector.broadcast %58 : vector<1x8xf32> to vector<8x8xf32>
    %60 = arith.addf %57, %59 : vector<8x8xf32>
    %61 = math.tanh %60 : vector<8x8xf32>
    %62 = math.exp %61 : vector<8x8xf32>
    %cst_45 = arith.constant dense<0.000000e+00> : vector<8xf32>
    %63 = vector.multi_reduction <add>, %62, %cst_45 [1] : vector<8x8xf32> to vector<8xf32>
    %64 = vector.shape_cast %63 : vector<8xf32> to vector<8x1xf32>
    %65 = tpu.reciprocal %64 {approx = true} : vector<8x1xf32> -> vector<8x1xf32>
    %66 = vector.broadcast %65 : vector<8x1xf32> to vector<8x8xf32>
    %67 = arith.mulf %62, %66 : vector<8x8xf32>
    %cst_46 = arith.constant 1.000000e-10 : f32
    %68 = vector.broadcast %cst_46 : f32 to vector<8x8xf32>
    %69 = arith.addf %67, %68 : vector<8x8xf32>
    %c0_47 = arith.constant 0 : index
    %c0_48 = arith.constant 0 : index
    %c0_49 = arith.constant 0 : index
    %70 = vector.load %arg1[%c0_47, %c0_48, %c0_49] : memref<8x8x32xf32, #tpu.memory_space<vmem>>, vector<8x1x32xf32>
    %71 = vector.shape_cast %70 : vector<8x1x32xf32> to vector<8x32xf32>
    %72 = vector.extract_strided_slice %69 {offsets = [0, 0], sizes = [8, 1], strides = [1, 1]} : vector<8x8xf32> to vector<8x1xf32>
    %73 = vector.broadcast %72 : vector<8x1xf32> to vector<8x32xf32>
    %74 = arith.mulf %71, %73 : vector<8x32xf32>
    %c0_50 = arith.constant 0 : index
    %c1_51 = arith.constant 1 : index
    %c0_52 = arith.constant 0 : index
    %75 = vector.load %arg1[%c0_50, %c1_51, %c0_52] : memref<8x8x32xf32, #tpu.memory_space<vmem>>, vector<8x1x32xf32>
    %76 = vector.shape_cast %75 : vector<8x1x32xf32> to vector<8x32xf32>
    %77 = vector.extract_strided_slice %69 {offsets = [0, 1], sizes = [8, 1], strides = [1, 1]} : vector<8x8xf32> to vector<8x1xf32>
    %78 = vector.broadcast %77 : vector<8x1xf32> to vector<8x32xf32>
    %79 = arith.mulf %76, %78 : vector<8x32xf32>
    %80 = arith.addf %74, %79 : vector<8x32xf32>
    %c0_53 = arith.constant 0 : index
    %c2_54 = arith.constant 2 : index
    %c0_55 = arith.constant 0 : index
    %81 = vector.load %arg1[%c0_53, %c2_54, %c0_55] : memref<8x8x32xf32, #tpu.memory_space<vmem>>, vector<8x1x32xf32>
    %82 = vector.shape_cast %81 : vector<8x1x32xf32> to vector<8x32xf32>
    %83 = vector.extract_strided_slice %69 {offsets = [0, 2], sizes = [8, 1], strides = [1, 1]} : vector<8x8xf32> to vector<8x1xf32>
    %84 = vector.broadcast %83 : vector<8x1xf32> to vector<8x32xf32>
    %85 = arith.mulf %82, %84 : vector<8x32xf32>
    %86 = arith.addf %80, %85 : vector<8x32xf32>
    %c0_56 = arith.constant 0 : index
    %c3_57 = arith.constant 3 : index
    %c0_58 = arith.constant 0 : index
    %87 = vector.load %arg1[%c0_56, %c3_57, %c0_58] : memref<8x8x32xf32, #tpu.memory_space<vmem>>, vector<8x1x32xf32>
    %88 = vector.shape_cast %87 : vector<8x1x32xf32> to vector<8x32xf32>
    %89 = vector.extract_strided_slice %69 {offsets = [0, 3], sizes = [8, 1], strides = [1, 1]} : vector<8x8xf32> to vector<8x1xf32>
    %90 = vector.broadcast %89 : vector<8x1xf32> to vector<8x32xf32>
    %91 = arith.mulf %88, %90 : vector<8x32xf32>
    %92 = arith.addf %86, %91 : vector<8x32xf32>
    %c0_59 = arith.constant 0 : index
    %c4_60 = arith.constant 4 : index
    %c0_61 = arith.constant 0 : index
    %93 = vector.load %arg1[%c0_59, %c4_60, %c0_61] : memref<8x8x32xf32, #tpu.memory_space<vmem>>, vector<8x1x32xf32>
    %94 = vector.shape_cast %93 : vector<8x1x32xf32> to vector<8x32xf32>
    %95 = vector.extract_strided_slice %69 {offsets = [0, 4], sizes = [8, 1], strides = [1, 1]} : vector<8x8xf32> to vector<8x1xf32>
    %96 = vector.broadcast %95 : vector<8x1xf32> to vector<8x32xf32>
    %97 = arith.mulf %94, %96 : vector<8x32xf32>
    %98 = arith.addf %92, %97 : vector<8x32xf32>
    %c0_62 = arith.constant 0 : index
    %c5_63 = arith.constant 5 : index
    %c0_64 = arith.constant 0 : index
    %99 = vector.load %arg1[%c0_62, %c5_63, %c0_64] : memref<8x8x32xf32, #tpu.memory_space<vmem>>, vector<8x1x32xf32>
    %100 = vector.shape_cast %99 : vector<8x1x32xf32> to vector<8x32xf32>
    %101 = vector.extract_strided_slice %69 {offsets = [0, 5], sizes = [8, 1], strides = [1, 1]} : vector<8x8xf32> to vector<8x1xf32>
    %102 = vector.broadcast %101 : vector<8x1xf32> to vector<8x32xf32>
    %103 = arith.mulf %100, %102 : vector<8x32xf32>
    %104 = arith.addf %98, %103 : vector<8x32xf32>
    %c0_65 = arith.constant 0 : index
    %c6_66 = arith.constant 6 : index
    %c0_67 = arith.constant 0 : index
    %105 = vector.load %arg1[%c0_65, %c6_66, %c0_67] : memref<8x8x32xf32, #tpu.memory_space<vmem>>, vector<8x1x32xf32>
    %106 = vector.shape_cast %105 : vector<8x1x32xf32> to vector<8x32xf32>
    %107 = vector.extract_strided_slice %69 {offsets = [0, 6], sizes = [8, 1], strides = [1, 1]} : vector<8x8xf32> to vector<8x1xf32>
    %108 = vector.broadcast %107 : vector<8x1xf32> to vector<8x32xf32>
    %109 = arith.mulf %106, %108 : vector<8x32xf32>
    %110 = arith.addf %104, %109 : vector<8x32xf32>
    %c0_68 = arith.constant 0 : index
    %c7_69 = arith.constant 7 : index
    %c0_70 = arith.constant 0 : index
    %111 = vector.load %arg1[%c0_68, %c7_69, %c0_70] : memref<8x8x32xf32, #tpu.memory_space<vmem>>, vector<8x1x32xf32>
    %112 = vector.shape_cast %111 : vector<8x1x32xf32> to vector<8x32xf32>
    %113 = vector.extract_strided_slice %69 {offsets = [0, 7], sizes = [8, 1], strides = [1, 1]} : vector<8x8xf32> to vector<8x1xf32>
    %114 = vector.broadcast %113 : vector<8x1xf32> to vector<8x32xf32>
    %115 = arith.mulf %112, %114 : vector<8x32xf32>
    %116 = arith.addf %110, %115 : vector<8x32xf32>
    %c0_71 = arith.constant 0 : index
    %c0_72 = arith.constant 0 : index
    %117 = vector.load %arg4[%c0_71, %c0_72] : memref<8x32xf32, #tpu.memory_space<vmem>>, vector<8x32xf32>
    tpu.vector_store %arg4[%c0_71, %c0_72], %116 {strides = array<i32>} : memref<8x32xf32, #tpu.memory_space<vmem>>, vector<8x32xf32>,
    return
  }
  func.func @transform_0(%arg0: i32) -> (i32, i32, i32) {
    %c0_i32 = arith.constant 0 : i32
    %c0_i32_0 = arith.constant 0 : i32
    %c0_i32_1 = arith.constant 0 : i32
    return %arg0, %c0_i32, %c0_i32_0 : i32, i32, i32
  }
  func.func @transform_1(%arg0: i32) -> (i32, i32) {
    %c0_i32 = arith.constant 0 : i32
    %c0_i32_0 = arith.constant 0 : i32
    %c0_i32_1 = arith.constant 0 : i32
    return %c0_i32, %c0_i32_0 : i32, i32
  }
  func.func @transform_2(%arg0: i32) -> (i32, i32) {
    %c0_i32 = arith.constant 0 : i32
    %c0_i32_0 = arith.constant 0 : i32
    %c0_i32_1 = arith.constant 0 : i32
    return %c0_i32, %c0_i32_0 : i32, i32
  }
  func.func @transform_3(%arg0: i32) -> (i32, i32) {
    %c0_i32 = arith.constant 0 : i32
    %c0_i32_0 = arith.constant 0 : i32
    return %arg0, %c0_i32 : i32, i32
  }
}

</mosaic_0001>

<bundles_post_ra>
// kernel: tpu_custom_call.1
= control target key start
LH: loop header
LB: loop body
LE: loop exit
PB: predicated region body
PF: predicated region fallthrough
CT: control target
= control target key end

     0   :  { %8 = vsyncpa [#allocation4], 0  ;;  %s1178_s0 = inlined_call_operand.hbm [shape: f32[8,8,32], index: 0, kind: input, shape index: {}]   ;;  %s1179_s1 = inlined_call_operand.vmem [shape: f32[1,32], index: 1, kind: input, shape index: {}]   ;;  %s1180_s2 = inlined_call_operand.vmem [shape: f32[1,8], index: 2, kind: input, shape index: {}]   ;;  %s1181_s3 = inlined_call_operand.hbm [shape: f32[8,32], index: 3, kind: output, shape index: {}]  }
   0x1   :  { %9 = vsyncpa [#allocation5], 0  ;;  %s860_s12 = smov [#allocation3]   ;;  %s812_s16 = scalar_lea.hbm %s1178_s0, 1024 }
   0x2   :  { %s15_s13 = sshll.u32 %s860_s12, 4  ;;  %p813_p0 = scmp.ne.s32.totalorder %s1178_s0, %s812_s16  ;;  %s16_s13 = int_to_ptr.vmem [resolvable:$true] %s15_s13 }
   0x3   :  { %p816_p1 = scmp.lt.u32.totalorder %s812_s16, %s1178_s0 }
   0x5   :  { %p818_p2 = pnand %p816_p1, %p813_p0 }
   0x7   :  { %821 = shalt.err (!%p818_p2)
}
   0x8   :  { %s822_s21 = scalar_lea.vmem %s16_s13, 1024  ;;  %p827_p4 = scmp.lt.s32.totalorder %s16_s13, %s16_s13 }
   0x9   :  { %p823_p3 = scmp.ne.s32.totalorder %s16_s13, %s822_s21  ;;  %p828_p5 = scmp.lt.s32.totalorder %s822_s21, %s822_s21 }
   0xb   :  { %p829_p6 = por %p828_p5, %p827_p4 }
   0xd   :  { %p830_p7 = pnand %p829_p6, %p823_p3 }
   0xf   :  { %833 = shalt.err (!%p830_p7)
}
  0x10   :  { %s861_s22 = smov 128   ;;  %s862_s23 = smov 8  }
  0x11   :  { %21 = dma.hbm_to_vmem [thread:$0]  %s1178_s0, 1024, %s16_s13, [#allocation4], %s861_s22, %s861_s22, %s862_s23  }
  0x12   :  { %856 = dma.done.wait [#allocation4], 1024  }
  0x13   :  { %857 = vsyncadd [#allocation4], 4294966272  ;;  %vm61_vm0 = vcmask 1041409   ;;  %vm64_vm1 = vcmask 1042434   ;;  %vm67_vm2 = vcmask 1043459   ;;  %vm70_vm3 = vcmask 1044484  }
  0x14   :  { %vm73_vm4 = vcmask 1045509   ;;  %vm76_vm5 = vcmask 1046534   ;;  %v907_v0 = vld [vmem:[%s1179_s1] ss:$0 sm:$0xff]  ;;  %v30_v1 = vld [vmem:[#allocation3] sm:$0x1] }
  0x15   :  { %v31_v2 = vld [vmem:[#allocation3 + $0x8] sm:$0x1]  ;;  %vm79_vm6 = vcmask 1047559   ;;  %v32_v3 = vld [vmem:[#allocation3 + $0x10] sm:$0x1]  ;;  %v44_v6 = vmul.f32 %v907_v0, %v30_v1  ;;  %vm82_vm7 = vcmask 261120  }
  0x16   :  { %v33_v4 = vld [vmem:[#allocation3 + $0x18] sm:$0x1]  ;;  %v34_v5 = vld [vmem:[#allocation3 + $0x20] sm:$0x1]  ;;  %v45_v7 = vmul.f32 %v907_v0, %v31_v2  ;;  %v35_v8 = vld [vmem:[#allocation3 + $0x28] sm:$0x1]  ;;  %v46_v11 = vmul.f32 %v907_v0, %v32_v3 }
  0x17   :  { %v36_v9 = vld [vmem:[#allocation3 + $0x30] sm:$0x1]  ;;  %v37_v10 = vld [vmem:[#allocation3 + $0x38] sm:$0x1]  ;;  %v47_v12 = vmul.f32 %v907_v0, %v33_v4  ;;  %v48_v13 = vmul.f32 %v907_v0, %v34_v5  ;;  %v49_v14 = vmul.f32 %v907_v0, %v35_v8  ;;  %v132_v18 = vld [vmem:[#allocation3 + $0x2] sm:$0x1] }
  0x18   :  { %v50_v15 = vmul.f32 %v907_v0, %v36_v9  ;;  %v51_v16 = vmul.f32 %v907_v0, %v37_v10  ;;  %v60_v17 = vrot.slane %v45_v7, 7  ;;  %v133_v19 = vld [vmem:[#allocation3 + $0xa] sm:$0x1]  ;;  %v63_v20 = vrot.slane %v46_v11, 6  ;;  %v134_v23 = vld [vmem:[#allocation3 + $0x12] sm:$0x1] }
  0x19   :  { %v66_v21 = vrot.slane %v47_v12, 5  ;;  %v69_v22 = vrot.slane %v48_v13, 4  ;;  %v140_v24 = vmul.f32 %v907_v0, %v132_v18  ;;  %v72_v26 = vrot.slane %v49_v14, 3  ;;  %v135_v29 = vld [vmem:[#allocation3 + $0x1a] sm:$0x1] }
  0x1a   :  { %v62_v25 = vsel %vm61_vm0, %v60_v17, %v44_v6  ;;  %v75_v27 = vrot.slane %v50_v15, 2  ;;  %v78_v28 = vrot.slane %v51_v16, 1  ;;  %v136_v31 = vld [vmem:[#allocation3 + $0x22] sm:$0x1]  ;;  %v137_v32 = vld [vmem:[#allocation3 + $0x2a] sm:$0x1]  ;;  %v141_v34 = vmul.f32 %v907_v0, %v133_v19 }
  0x1b   :  { %v65_v30 = vsel %vm64_vm1, %v63_v20, %v62_v25  ;;  %v138_v33 = vld [vmem:[#allocation3 + $0x32] sm:$0x1]  ;;  %v142_v35 = vmul.f32 %v907_v0, %v134_v23  ;;  %v143_v36 = vmul.f32 %v907_v0, %v135_v29  ;;  %v139_v38 = vld [vmem:[#allocation3 + $0x3a] sm:$0x1]  ;;  %v144_v39 = vmul.f32 %v907_v0, %v136_v31  ;;  %v88_v42 = vld [vmem:[#allocation3 + $0x1] sm:$0x1] }
  0x1c   :  { %v68_v37 = vsel %vm67_vm2, %v66_v21, %v65_v30  ;;  %v145_v40 = vmul.f32 %v907_v0, %v137_v32  ;;  %v146_v41 = vmul.f32 %v907_v0, %v138_v33  ;;  %v89_v43 = vld [vmem:[#allocation3 + $0x9] sm:$0x1]  ;;  %v147_v45 = vmul.f32 %v907_v0, %v139_v38  ;;  %v90_v48 = vld [vmem:[#allocation3 + $0x11] sm:$0x1]  ;;  %v91_v49 = vld [vmem:[#allocation3 + $0x19] sm:$0x1] }
  0x1d   :  { %v71_v44 = vsel %vm70_vm3, %v69_v22, %v68_v37  ;;  %v156_v46 = vrot.slane %v141_v34, 7  ;;  %v158_v47 = vrot.slane %v142_v35, 6  ;;  %v160_v51 = vrot.slane %v143_v36, 5  ;;  %v92_v54 = vld [vmem:[#allocation3 + $0x21] sm:$0x1] }
  0x1e   :  { %v74_v50 = vsel %vm73_vm4, %v72_v26, %v71_v44  ;;  %v162_v52 = vrot.slane %v144_v39, 4  ;;  %v164_v53 = vrot.slane %v145_v40, 3  ;;  %v166_v57 = vrot.slane %v146_v41, 2  ;;  %v93_v59 = vld [vmem:[#allocation3 + $0x29] sm:$0x1] }
  0x1f   :  { %v77_v55 = vsel %vm76_vm5, %v75_v27, %v74_v50  ;;  %v157_v56 = vsel %vm61_vm0, %v156_v46, %v140_v24  ;;  %v168_v58 = vrot.slane %v147_v45, 1  ;;  %v94_v60 = vld [vmem:[#allocation3 + $0x31] sm:$0x1]  ;;  %v95_v63 = vld [vmem:[#allocation3 + $0x39] sm:$0x1]  ;;  %v96_v1 = vmul.f32 %v907_v0, %v88_v42 }
  0x20   :  { %v80_v61 = vsel %vm79_vm6, %v78_v28, %v77_v55  ;;  %v159_v62 = vsel %vm64_vm1, %v158_v47, %v157_v56  ;;  %v97_v2 = vmul.f32 %v907_v0, %v89_v43  ;;  %v98_v5 = vmul.f32 %v907_v0, %v90_v48  ;;  %v176_v11 = vld [vmem:[#allocation3 + $0x3] sm:$0x1]  ;;  %v177_v12 = vld [vmem:[#allocation3 + $0xb] sm:$0x1]  ;;  %v178_v13 = vld [vmem:[#allocation3 + $0x13] sm:$0x1] }
  0x21   :  { %v83_v3 = vsel %vm82_vm7, %v80_v61, 0.0  ;;  %v161_v4 = vsel %vm67_vm2, %v160_v51, %v159_v62  ;;  %v99_v6 = vmul.f32 %v907_v0, %v91_v49  ;;  %v100_v8 = vmul.f32 %v907_v0, %v92_v54  ;;  %v179_v18 = vld [vmem:[#allocation3 + $0x1b] sm:$0x1]  ;;  %v180_v19 = vld [vmem:[#allocation3 + $0x23] sm:$0x1] }
  0x22   :  { %84 = vadd.xlane.f32.xlu0 %v83_v3  ;;  %v163_v7 = vsel %vm70_vm3, %v162_v52, %v161_v4  ;;  %v101_v9 = vmul.f32 %v907_v0, %v93_v59  ;;  %v102_v10 = vmul.f32 %v907_v0, %v94_v60  ;;  %v103_v15 = vmul.f32 %v907_v0, %v95_v63  ;;  %v181_v24 = vld [vmem:[#allocation3 + $0x2b] sm:$0x1]  ;;  %v182_v29 = vld [vmem:[#allocation3 + $0x33] sm:$0x1]  ;;  %v183_v30 = vld [vmem:[#allocation3 + $0x3b] sm:$0x1] }
  0x23   :  { %v165_v14 = vsel %vm73_vm4, %v164_v53, %v163_v7  ;;  %v112_v16 = vrot.slane %v97_v2, 7  ;;  %v114_v17 = vrot.slane %v98_v5, 6  ;;  %v116_v21 = vrot.slane %v99_v6, 5  ;;  %v220_v39 = vld [vmem:[#allocation3 + $0x4] sm:$0x1] }
  0x24   :  { %v167_v20 = vsel %vm76_vm5, %v166_v57, %v165_v14  ;;  %v118_v22 = vrot.slane %v100_v8, 4  ;;  %v120_v23 = vrot.slane %v101_v9, 3  ;;  %v122_v27 = vrot.slane %v102_v10, 2  ;;  %v221_v44 = vld [vmem:[#allocation3 + $0xc] sm:$0x1] }
  0x25   :  { %v169_v25 = vsel %vm79_vm6, %v168_v58, %v167_v20  ;;  %v113_v26 = vsel %vm61_vm0, %v112_v16, %v96_v1  ;;  %v124_v28 = vrot.slane %v103_v15, 1  ;;  %v184_v33 = vmul.f32 %v907_v0, %v176_v11  ;;  %v222_v45 = vld [vmem:[#allocation3 + $0x14] sm:$0x1]  ;;  %v223_v46 = vld [vmem:[#allocation3 + $0x1c] sm:$0x1] }
  0x26   :  { %v171_v31 = vsel %vm82_vm7, %v169_v25, 0.0  ;;  %v115_v32 = vsel %vm64_vm1, %v114_v17, %v113_v26  ;;  %v185_v34 = vmul.f32 %v907_v0, %v177_v12  ;;  %v186_v36 = vmul.f32 %v907_v0, %v178_v13  ;;  %v224_v51 = vld [vmem:[#allocation3 + $0x24] sm:$0x1]  ;;  %v225_v56 = vld [vmem:[#allocation3 + $0x2c] sm:$0x1] }
  0x27   :  { %172 = vadd.xlane.f32.xlu1 %v171_v31  ;;  %v117_v35 = vsel %vm67_vm2, %v116_v21, %v115_v32  ;;  %v187_v37 = vmul.f32 %v907_v0, %v179_v18  ;;  %v188_v38 = vmul.f32 %v907_v0, %v180_v19  ;;  %v189_v41 = vmul.f32 %v907_v0, %v181_v24  ;;  %v226_v60 = vld [vmem:[#allocation3 + $0x34] sm:$0x1]  ;;  %v227_v61 = vld [vmem:[#allocation3 + $0x3c] sm:$0x1]  ;;  %v264_v8 = vld [vmem:[#allocation3 + $0x5] sm:$0x1] }
  0x28   :  { %v119_v40 = vsel %vm70_vm3, %v118_v22, %v117_v35  ;;  %v190_v42 = vmul.f32 %v907_v0, %v182_v29  ;;  %v191_v43 = vmul.f32 %v907_v0, %v183_v30  ;;  %v200_v48 = vrot.slane %v185_v34, 7  ;;  %v265_v13 = vld [vmem:[#allocation3 + $0xd] sm:$0x1]  ;;  %v266_v14 = vld [vmem:[#allocation3 + $0x15] sm:$0x1] }
  0x29   :  { %v121_v47 = vsel %vm73_vm4, %v120_v23, %v119_v40  ;;  %v202_v49 = vrot.slane %v186_v36, 6  ;;  %v204_v50 = vrot.slane %v187_v37, 5  ;;  %v206_v53 = vrot.slane %v188_v38, 4  ;;  %v267_v19 = vld [vmem:[#allocation3 + $0x1d] sm:$0x1] }
  0x2a   :  { %v123_v52 = vsel %vm76_vm5, %v122_v27, %v121_v47  ;;  %v208_v54 = vrot.slane %v189_v41, 3  ;;  %v210_v55 = vrot.slane %v190_v42, 2  ;;  %v201_v58 = vsel %vm61_vm0, %v200_v48, %v184_v33  ;;  %v268_v24 = vld [vmem:[#allocation3 + $0x25] sm:$0x1]  ;;  %v269_v25 = vld [vmem:[#allocation3 + $0x2d] sm:$0x1] }
  0x2b   :  { %v125_v57 = vsel %vm79_vm6, %v124_v28, %v123_v52  ;;  %v212_v59 = vrot.slane %v191_v43, 1  ;;  %v228_v62 = vmul.f32 %v907_v0, %v220_v39  ;;  %v203_v1 = vsel %vm64_vm1, %v202_v49, %v201_v58  ;;  %v270_v29 = vld [vmem:[#allocation3 + $0x35] sm:$0x1]  ;;  %v271_v30 = vld [vmem:[#allocation3 + $0x3d] sm:$0x1] }
  0x2c   :  { %v127_v63 = vsel %vm82_vm7, %v125_v57, 0.0  ;;  %v229_v2 = vmul.f32 %v907_v0, %v221_v44  ;;  %v230_v3 = vmul.f32 %v907_v0, %v222_v45  ;;  %v205_v4 = vsel %vm67_vm2, %v204_v50, %v203_v1  ;;  %v308_v40 = vld [vmem:[#allocation3 + $0x6] sm:$0x1]  ;;  %v309_v41 = vld [vmem:[#allocation3 + $0xe] sm:$0x1] }
  0x2d   :  { %128 = vadd.xlane.f32.xlu0 %v127_v63  ;;  %v231_v5 = vmul.f32 %v907_v0, %v223_v46  ;;  %v232_v6 = vmul.f32 %v907_v0, %v224_v51  ;;  %v233_v7 = vmul.f32 %v907_v0, %v225_v56  ;;  %v207_v9 = vsel %vm70_vm3, %v206_v53, %v205_v4  ;;  %v310_v46 = vld [vmem:[#allocation3 + $0x16] sm:$0x1]  ;;  %v311_v47 = vld [vmem:[#allocation3 + $0x1e] sm:$0x1]  ;;  %v312_v52 = vld [vmem:[#allocation3 + $0x26] sm:$0x1] }
  0x2e   :  { %v234_v10 = vmul.f32 %v907_v0, %v226_v60  ;;  %v235_v11 = vmul.f32 %v907_v0, %v227_v61  ;;  %v244_v12 = vrot.slane %v229_v2, 7  ;;  %v209_v15 = vsel %vm73_vm4, %v208_v54, %v207_v9  ;;  %v313_v57 = vld [vmem:[#allocation3 + $0x2e] sm:$0x1]  ;;  %v314_v58 = vld [vmem:[#allocation3 + $0x36] sm:$0x1] }
  0x2f   :  { %v246_v16 = vrot.slane %v230_v3, 6  ;;  %v248_v17 = vrot.slane %v231_v5, 5  ;;  %v250_v18 = vrot.slane %v232_v6, 4  ;;  %v211_v20 = vsel %vm76_vm5, %v210_v55, %v209_v15  ;;  %v352_v9 = vld [vmem:[#allocation3 + $0x7] sm:$0x1] }
  0x30   :  { %v245_v21 = vsel %vm61_vm0, %v244_v12, %v228_v62  ;;  %v252_v22 = vrot.slane %v233_v7, 3  ;;  %v254_v23 = vrot.slane %v234_v10, 2  ;;  %v213_v26 = vsel %vm79_vm6, %v212_v59, %v211_v20  ;;  %v315_v62 = vld [vmem:[#allocation3 + $0x3e] sm:$0x1]  ;;  %v353_v10 = vld [vmem:[#allocation3 + $0xf] sm:$0x1] }
  0x31   :  { %v247_v27 = vsel %vm64_vm1, %v246_v16, %v245_v21  ;;  %v256_v28 = vrot.slane %v235_v11, 1  ;;  %v272_v31 = vmul.f32 %v907_v0, %v264_v8  ;;  %v215_v32 = vsel %vm82_vm7, %v213_v26, 0.0  ;;  %v354_v11 = vld [vmem:[#allocation3 + $0x17] sm:$0x1]  ;;  %v355_v16 = vld [vmem:[#allocation3 + $0x1f] sm:$0x1] }
  0x32   :  { %v249_v33 = vsel %vm67_vm2, %v248_v17, %v247_v27  ;;  %v273_v34 = vmul.f32 %v907_v0, %v265_v13  ;;  %v274_v35 = vmul.f32 %v907_v0, %v266_v14  ;;  %216 = vadd.xlane.f32.xlu1 %v215_v32  ;;  %v275_v37 = vmul.f32 %v907_v0, %v267_v19  ;;  %v356_v17 = vld [vmem:[#allocation3 + $0x27] sm:$0x1]  ;;  %v358_v27 = vld [vmem:[#allocation3 + $0x37] sm:$0x1] }
  0x33   :  { %v251_v36 = vsel %vm70_vm3, %v250_v18, %v249_v33  ;;  %v276_v38 = vmul.f32 %v907_v0, %v268_v24  ;;  %v277_v39 = vmul.f32 %v907_v0, %v269_v25  ;;  %v278_v43 = vmul.f32 %v907_v0, %v270_v29 }
  0x34   :  { %v253_v42 = vsel %vm73_vm4, %v252_v22, %v251_v36  ;;  %v279_v44 = vmul.f32 %v907_v0, %v271_v30  ;;  %v288_v45 = vrot.slane %v273_v34, 7  ;;  %v290_v49 = vrot.slane %v274_v35, 6  ;;  %v357_v22 = vld [vmem:[#allocation3 + $0x2f] sm:$0x1] }
  0x35   :  { %v255_v48 = vsel %vm76_vm5, %v254_v23, %v253_v42  ;;  %v292_v50 = vrot.slane %v275_v37, 5  ;;  %v294_v51 = vrot.slane %v276_v38, 4  ;;  %v296_v55 = vrot.slane %v277_v39, 3 }
  0x36   :  { %v257_v53 = vsel %vm79_vm6, %v256_v28, %v255_v48  ;;  %v289_v54 = vsel %vm61_vm0, %v288_v45, %v272_v31  ;;  %v298_v56 = vrot.slane %v278_v43, 2  ;;  %v300_v61 = vrot.slane %v279_v44, 1  ;;  %v359_v28 = vld [vmem:[#allocation3 + $0x3f] sm:$0x1] }
  0x37   :  { %v259_v59 = vsel %vm82_vm7, %v257_v53, 0.0  ;;  %v291_v60 = vsel %vm64_vm1, %v290_v49, %v289_v54  ;;  %v316_v63 = vmul.f32 %v907_v0, %v308_v40  ;;  %v317_v2 = vmul.f32 %v907_v0, %v309_v41 }
  0x38   :  { %260 = vadd.xlane.f32.xlu0 %v259_v59  ;;  %v293_v1 = vsel %vm67_vm2, %v292_v50, %v291_v60  ;;  %v318_v3 = vmul.f32 %v907_v0, %v310_v46  ;;  %v319_v4 = vmul.f32 %v907_v0, %v311_v47  ;;  %v320_v6 = vmul.f32 %v907_v0, %v312_v52 }
  0x39   :  { %v295_v5 = vsel %vm70_vm3, %v294_v51, %v293_v1  ;;  %v321_v7 = vmul.f32 %v907_v0, %v313_v57  ;;  %v322_v8 = vmul.f32 %v907_v0, %v314_v58  ;;  %v323_v13 = vmul.f32 %v907_v0, %v315_v62 }
  0x3a   :  { %v297_v12 = vsel %vm73_vm4, %v296_v55, %v295_v5  ;;  %v332_v14 = vrot.slane %v317_v2, 7  ;;  %v334_v15 = vrot.slane %v318_v3, 6  ;;  %v336_v19 = vrot.slane %v319_v4, 5  ;;  %v784_v4 = vld [vmem:[%s1180_s2] ss:$0 sm:$0xff]  ;;  %s871_s2 = smov [#allocation6]  }
  0x3b   :  { %v299_v18 = vsel %vm76_vm5, %v298_v56, %v297_v12  ;;  %v338_v20 = vrot.slane %v320_v6, 4  ;;  %v340_v21 = vrot.slane %v321_v7, 3  ;;  %v342_v25 = vrot.slane %v322_v8, 2  ;;  %s774_s28 = sshll.u32 %s871_s2, 4  ;;  %s775_s28 = int_to_ptr.vmem [resolvable:$true] %s774_s28 }
  0x3c   :  { %v301_v23 = vsel %vm79_vm6, %v300_v61, %v299_v18  ;;  %v333_v24 = vsel %vm61_vm0, %v332_v14, %v316_v63  ;;  %v344_v26 = vrot.slane %v323_v13, 1  ;;  %v360_v31 = vmul.f32 %v907_v0, %v352_v9  ;;  %s834_s29 = scalar_lea.vmem %s775_s28, 128  ;;  %p839_p9 = scmp.lt.s32.totalorder %s775_s28, %s775_s28 }
  0x3d   :  { %v303_v29 = vsel %vm82_vm7, %v301_v23, 0.0  ;;  %v335_v30 = vsel %vm64_vm1, %v334_v15, %v333_v24  ;;  %v361_v32 = vmul.f32 %v907_v0, %v353_v10  ;;  %v362_v34 = vmul.f32 %v907_v0, %v354_v11  ;;  %v450_v23 = vld [vmem:[#allocation3 + $0x1] sm:$0x1]  ;;  %v451_v24 = vld [vmem:[#allocation3 + $0x9] sm:$0x1]  ;;  %p835_p8 = scmp.ne.s32.totalorder %s775_s28, %s834_s29  ;;  %p840_p10 = scmp.lt.s32.totalorder %s834_s29, %s834_s29 }
  0x3e   :  { %304 = vadd.xlane.f32.xlu1 %v303_v29  ;;  %v337_v33 = vsel %vm67_vm2, %v336_v19, %v335_v30  ;;  %v363_v35 = vmul.f32 %v907_v0, %v355_v16  ;;  %v364_v36 = vmul.f32 %v907_v0, %v356_v17  ;;  %v365_v38 = vmul.f32 %v907_v0, %v357_v22  ;;  %v456_v29 = vld [vmem:[#allocation3 + $0x31] sm:$0x1]  ;;  %v457_v30 = vld [vmem:[#allocation3 + $0x39] sm:$0x1] }
  0x3f   :  { %v339_v37 = vsel %vm70_vm3, %v338_v20, %v337_v33  ;;  %v366_v39 = vmul.f32 %v907_v0, %v358_v27  ;;  %v367_v40 = vmul.f32 %v907_v0, %v359_v28  ;;  %v376_v42 = vrot.slane %v361_v32, 7  ;;  %v454_v27 = vld [vmem:[#allocation3 + $0x21] sm:$0x1]  ;;  %v455_v28 = vld [vmem:[#allocation3 + $0x29] sm:$0x1]  ;;  %p841_p11 = por %p840_p10, %p839_p9 }
  0x40   :  { %v341_v41 = vsel %vm73_vm4, %v340_v21, %v339_v37  ;;  %v378_v43 = vrot.slane %v362_v34, 6  ;;  %v380_v44 = vrot.slane %v363_v35, 5  ;;  %v382_v46 = vrot.slane %v364_v36, 4  ;;  %v415_v37 = vld [vmem:[#allocation3] sm:$0x1] }
  0x41   :  { %v343_v45 = vsel %vm76_vm5, %v342_v25, %v341_v41  ;;  %v377_v48 = vsel %vm61_vm0, %v376_v42, %v360_v31  ;;  %v384_v49 = vrot.slane %v365_v38, 3  ;;  %v386_v52 = vrot.slane %v366_v39, 2  ;;  %v452_v25 = vld [vmem:[#allocation3 + $0x11] sm:$0x1]  ;;  %v416_v42 = vld [vmem:[#allocation3 + $0x8] sm:$0x1]  ;;  %p842_p12 = pnand %p841_p11, %p835_p8 }
  0x42   :  { %v345_v47 = vsel %vm79_vm6, %v344_v26, %v343_v45  ;;  %v379_v51 = vsel %vm64_vm1, %v378_v43, %v377_v48  ;;  %v388_v53 = vrot.slane %v367_v40, 1  ;;  %vm86_vm8 = vcmask 7168   ;;  %v453_v26 = vld [vmem:[#allocation3 + $0x19] sm:$0x1]  ;;  %v418_v48 = vld [vmem:[#allocation3 + $0x18] sm:$0x1] }
  0x43   :  { %v347_v50 = vsel %vm82_vm7, %v345_v47, 0.0  ;;  %v381_v0 = vsel %vm67_vm2, %v380_v44, %v379_v51  ;;  %vm130_vm9 = vcmask 15368   ;;  %vm174_vm10 = vcmask 23568   ;;  %v417_v47 = vld [vmem:[#allocation3 + $0x10] sm:$0x1] }
  0x44   :  { %348 = vadd.xlane.f32.xlu0 %v347_v50  ;;  %v383_v54 = vsel %vm70_vm3, %v382_v46, %v381_v0  ;;  %vm218_vm11 = vcmask 31768   ;;  %vm262_vm12 = vcmask 39968   ;;  %vm306_vm13 = vcmask 48168   ;;  %v420_v0 = vld [vmem:[#allocation3 + $0x28] sm:$0x1] }
  0x45   :  { %v385_v55 = vsel %vm73_vm4, %v384_v49, %v383_v54  ;;  %vm350_vm14 = vcmask 56368   ;;  %vm394_vm15 = vcmask 64568   ;;  %v863_v11 = vmov 1   ;;  %v419_v49 = vld [vmem:[#allocation3 + $0x20] sm:$0x1] }
  0x46   :  { %v387_v56 = vsel %vm76_vm5, %v386_v52, %v385_v55  ;;  %798 = vset.pattern.permute.xlu0 %v863_v11  ;;  %v864_v12 = vmov 0   ;;  %v865_v17 = vmov 2   ;;  %v866_v18 = vmov 7   ;;  %v422_v55 = vld [vmem:[#allocation3 + $0x38] sm:$0x1] }
  0x47   :  { %v389_v57 = vsel %vm79_vm6, %v388_v53, %v387_v56  ;;  %797 = vset.pattern.permute.xlu1 %v864_v12  ;;  %v867_v19 = vmov 3   ;;  %v868_v20 = vmov 4   ;;  %v869_v21 = vmov 5   ;;  %v421_v53 = vld [vmem:[#allocation3 + $0x30] sm:$0x1] }
  0x48   :  { %v391_v58 = vsel %vm82_vm7, %v389_v57, 0.0  ;;  %v870_v22 = vmov 6   ;;  %v493_v11 = vld [vmem:[#allocation3 + $0xa] sm:$0x1]  ;;  %v494_v12 = vld [vmem:[#allocation3 + $0x12] sm:$0x1] }
  0x49   :  { %392 = vadd.xlane.f32.xlu1 %v391_v58 }
  0xaf   :  { %v85_v59 = vpop.xlane.xlu0 %84 }
  0xb0   :  { %87 = vst.msk [vmem:[#allocation2] sm:$0xff] %vm86_vm8, %v85_v59  ;;  %vm408_vm8 = vcmask 64512  }
  0xb4   :  { %v173_v60 = vpop.xlane.xlu1 %172 }
  0xba   :  { %v129_v61 = vpop.xlane.xlu0 %128 }
  0xbb   :  { %131 = vst.msk [vmem:[#allocation2] sm:$0xff] %vm130_vm9, %v129_v61 }
  0xbc   :  { %175 = vst.msk [vmem:[#allocation2] sm:$0xff] %vm174_vm10, %v173_v60 }
  0xbf   :  { %v217_v62 = vpop.xlane.xlu1 %216 }
  0xc0   :  { %219 = vst.msk [vmem:[#allocation2] sm:$0xff] %vm218_vm11, %v217_v62 }
  0xc5   :  { %v261_v63 = vpop.xlane.xlu0 %260 }
  0xc6   :  { %263 = vst.msk [vmem:[#allocation2] sm:$0xff] %vm262_vm12, %v261_v63 }
  0xcb   :  { %v305_v1 = vpop.xlane.xlu1 %304 }
  0xcc   :  { %307 = vst.msk [vmem:[#allocation2] sm:$0xff] %vm306_vm13, %v305_v1 }
  0xd1   :  { %v349_v2 = vpop.xlane.xlu0 %348 }
  0xd2   :  { %351 = vst.msk [vmem:[#allocation2] sm:$0xff] %vm350_vm14, %v349_v2 }
  0xd6   :  { %v393_v3 = vpop.xlane.xlu1 %392 }
  0xd7   :  { %395 = vst.msk [vmem:[#allocation2] sm:$0xff] %vm394_vm15, %v393_v3 }
  0xde   :  { %v396_v5 = vld [vmem:[#allocation2] sm:$0xff] }
  0xdf   :  { %v404_v6 = vadd.f32 %v784_v4, %v396_v5 }
  0xe1   :  { %806 = vtanh.f32 %v404_v6 }
  0xeb   :  { %v807_v7 = vpop.eup %806 }
  0xec   :  { %v406_v8 = vmul.f32 1.442695, %v807_v7 }
  0xee   :  { %808 = vpow2.f32 %v406_v8 }
  0xf8   :  { %v809_v9 = vpop.eup %808 }
  0xf9   :  { %v409_v10 = vsel %vm408_vm8, %v809_v9, 0.0 }
  0xfa   :  { %410 = vadd.xlane.f32.xlu0 %v409_v10  ;;  %v492_v10 = vld [vmem:[#allocation3 + $0x2] sm:$0x1] }
 0x187   :  { %v411_v13 = vpop.xlane.xlu0 %410 }
 0x188   :  { %810 = vrcp.f32 %v411_v13 }
 0x192   :  { %v811_v14 = vpop.eup %810 }
 0x193   :  { %v413_v15 = vmul.f32 %v811_v14, %v809_v9 }
 0x195   :  { %v414_v16 = vadd.f32 1e-10, %v413_v15 }
 0x197   :  { %459 = vperm.xlu0 %798, %v414_v16   ;;  %425 = vperm.xlu1 %797, %v414_v16  }
 0x19b   :  { %799 = vset.pattern.permute.xlu1 %v865_v17  ;;  %805 = vset.pattern.permute.xlu0 %v866_v18  ;;  %v495_v17 = vld [vmem:[#allocation3 + $0x1a] sm:$0x1] }
 0x19c   :  { %501 = vperm.xlu1 %799, %v414_v16  }
 0x1a0   :  { %800 = vset.pattern.permute.xlu1 %v867_v19  ;;  %v497_v19 = vld [vmem:[#allocation3 + $0x2a] sm:$0x1] }
 0x1a1   :  { %543 = vperm.xlu1 %800, %v414_v16  }
 0x1a5   :  { %801 = vset.pattern.permute.xlu1 %v868_v20  ;;  %v498_v20 = vld [vmem:[#allocation3 + $0x32] sm:$0x1] }
 0x1a6   :  { %585 = vperm.xlu1 %801, %v414_v16  }
 0x1aa   :  { %802 = vset.pattern.permute.xlu1 %v869_v21 }
 0x1ab   :  { %627 = vperm.xlu1 %802, %v414_v16  }
 0x1af   :  { %803 = vset.pattern.permute.xlu1 %v870_v22 }
 0x1b0   :  { %669 = vperm.xlu1 %803, %v414_v16  }
 0x1b4   :  { %804 = vset.pattern.permute.xlu1 %v866_v18  ;;  %v496_v18 = vld [vmem:[#allocation3 + $0x22] sm:$0x1] }
 0x1b5   :  { %711 = vperm.xlu1 %804, %v414_v16  }
 0x216   :  { %v460_v31 = vpop.permute.xlu0 %459  ;;  %v426_v32 = vpop.permute.xlu1 %425 }
 0x217   :  { %v461_v33 = vrot.slane %v460_v31, 1  ;;  %v462_v34 = vrot.slane %v460_v31, 2  ;;  %v463_v35 = vrot.slane %v460_v31, 3  ;;  %v464_v36 = vrot.slane %v460_v31, 4 }
 0x218   :  { %v465_v38 = vrot.slane %v460_v31, 5  ;;  %v466_v39 = vrot.slane %v460_v31, 6  ;;  %v467_v40 = vrot.slane %v460_v31, 7  ;;  %v476_v41 = vmul.f32 %v460_v31, %v450_v23 }
 0x219   :  { %v477_v43 = vmul.f32 %v461_v33, %v451_v24  ;;  %v478_v44 = vmul.f32 %v462_v34, %v452_v25  ;;  %v479_v45 = vmul.f32 %v463_v35, %v453_v26  ;;  %v480_v46 = vmul.f32 %v464_v36, %v454_v27  ;;  %v534_v34 = vld [vmem:[#allocation3 + $0x3] sm:$0x1] }
 0x21a   :  { %v481_v50 = vmul.f32 %v465_v38, %v455_v28  ;;  %v1040_v51 = vmul.f32 %v466_v39, %v456_v29  ;;  %v1042_v52 = vmul.f32 %v467_v40, %v457_v30  ;;  %v427_v54 = vrot.slane %v426_v32, 1  ;;  %v535_v38 = vld [vmem:[#allocation3 + $0xb] sm:$0x1]  ;;  %v536_v39 = vld [vmem:[#allocation3 + $0x13] sm:$0x1] }
 0x21b   :  { %v428_v56 = vrot.slane %v426_v32, 2  ;;  %v429_v57 = vrot.slane %v426_v32, 3  ;;  %v430_v58 = vrot.slane %v426_v32, 4  ;;  %v431_v59 = vrot.slane %v426_v32, 5  ;;  %v1044_v60 = vpop.permute.xlu1 %501 }
 0x21c   :  { %v432_v61 = vrot.slane %v426_v32, 6  ;;  %v433_v62 = vrot.slane %v426_v32, 7  ;;  %v442_v63 = vmul.f32 %v426_v32, %v415_v37  ;;  %v443_v1 = vmul.f32 %v427_v54, %v416_v42 }
 0x21d   :  { %v444_v2 = vmul.f32 %v428_v56, %v417_v47  ;;  %v445_v3 = vmul.f32 %v429_v57, %v418_v48  ;;  %v446_v4 = vmul.f32 %v430_v58, %v419_v49  ;;  %v447_v5 = vmul.f32 %v431_v59, %v420_v0  ;;  %v539_v47 = vld [vmem:[#allocation3 + $0x2b] sm:$0x1] }
 0x21e   :  { %v1046_v6 = vmul.f32 %v432_v61, %v421_v53  ;;  %v1048_v7 = vmul.f32 %v433_v62, %v422_v55  ;;  %v484_v8 = vadd.f32 %v476_v41, %v442_v63  ;;  %v485_v9 = vadd.f32 %v477_v43, %v443_v1  ;;  %v576_v63 = vld [vmem:[#allocation3 + $0x4] sm:$0x1]  ;;  %v577_v1 = vld [vmem:[#allocation3 + $0xc] sm:$0x1] }
 0x21f   :  { %v486_v13 = vadd.f32 %v478_v44, %v444_v2  ;;  %v487_v14 = vadd.f32 %v479_v45, %v445_v3  ;;  %v488_v15 = vadd.f32 %v480_v46, %v446_v4  ;;  %v1050_v16 = vadd.f32 %v481_v50, %v447_v5  ;;  %v537_v45 = vld [vmem:[#allocation3 + $0x1b] sm:$0x1]  ;;  %v538_v46 = vld [vmem:[#allocation3 + $0x23] sm:$0x1]  ;;  %v578_v2 = vld [vmem:[#allocation3 + $0x14] sm:$0x1] }
 0x220   :  { %v503_v21 = vrot.slane %v1044_v60, 1  ;;  %v504_v22 = vrot.slane %v1044_v60, 2  ;;  %v505_v23 = vrot.slane %v1044_v60, 3  ;;  %v506_v24 = vrot.slane %v1044_v60, 4  ;;  %v1056_v25 = vpop.permute.xlu1 %543  ;;  %v579_v5 = vld [vmem:[#allocation3 + $0x1c] sm:$0x1] }
 0x221   :  { %v507_v26 = vrot.slane %v1044_v60, 5  ;;  %v508_v27 = vrot.slane %v1044_v60, 6  ;;  %v509_v28 = vrot.slane %v1044_v60, 7  ;;  %v518_v29 = vmul.f32 %v1044_v60, %v492_v10 }
 0x222   :  { %v519_v30 = vmul.f32 %v503_v21, %v493_v11  ;;  %v520_v31 = vmul.f32 %v504_v22, %v494_v12  ;;  %v521_v32 = vmul.f32 %v505_v23, %v495_v17  ;;  %v522_v33 = vmul.f32 %v506_v24, %v496_v18  ;;  %v619_v21 = vld [vmem:[#allocation3 + $0xd] sm:$0x1] }
 0x223   :  { %v1062_v35 = vmul.f32 %v507_v26, %v497_v19  ;;  %v1064_v36 = vmul.f32 %v508_v27, %v498_v20  ;;  %v526_v37 = vadd.f32 %v518_v29, %v484_v8  ;;  %v545_v40 = vrot.slane %v1056_v25, 1  ;;  %v580_v8 = vld [vmem:[#allocation3 + $0x24] sm:$0x1]  ;;  %v618_v20 = vld [vmem:[#allocation3 + $0x5] sm:$0x1] }
 0x224   :  { %v527_v41 = vadd.f32 %v519_v30, %v485_v9  ;;  %v528_v42 = vadd.f32 %v520_v31, %v486_v13  ;;  %v529_v43 = vadd.f32 %v521_v32, %v487_v14  ;;  %v1067_v44 = vadd.f32 %v522_v33, %v488_v15  ;;  %v620_v27 = vld [vmem:[#allocation3 + $0x15] sm:$0x1]  ;;  %v621_v29 = vld [vmem:[#allocation3 + $0x1d] sm:$0x1] }
 0x225   :  { %v546_v48 = vrot.slane %v1056_v25, 2  ;;  %v547_v49 = vrot.slane %v1056_v25, 3  ;;  %v548_v50 = vrot.slane %v1056_v25, 4  ;;  %v549_v0 = vrot.slane %v1056_v25, 5  ;;  %v1073_v53 = vpop.permute.xlu1 %585 }
 0x226   :  { %v550_v54 = vrot.slane %v1056_v25, 6  ;;  %v551_v55 = vrot.slane %v1056_v25, 7  ;;  %v560_v56 = vmul.f32 %v1056_v25, %v534_v34  ;;  %v561_v57 = vmul.f32 %v545_v40, %v535_v38 }
 0x227   :  { %v562_v58 = vmul.f32 %v546_v48, %v536_v39  ;;  %v563_v59 = vmul.f32 %v547_v49, %v537_v45  ;;  %v1078_v61 = vmul.f32 %v548_v50, %v538_v46  ;;  %v1080_v62 = vmul.f32 %v549_v0, %v539_v47  ;;  %v660_v47 = vld [vmem:[#allocation3 + $0x6] sm:$0x1]  ;;  %v661_v48 = vld [vmem:[#allocation3 + $0xe] sm:$0x1]  ;;  %v662_v49 = vld [vmem:[#allocation3 + $0x16] sm:$0x1] }
 0x228   :  { %v568_v3 = vadd.f32 %v560_v56, %v526_v37  ;;  %v569_v4 = vadd.f32 %v561_v57, %v527_v41  ;;  %v587_v9 = vrot.slane %v1073_v53, 1  ;;  %v588_v10 = vrot.slane %v1073_v53, 2  ;;  %v499_v37 = vld [vmem:[#allocation3 + $0x3a] sm:$0x1]  ;;  %v663_v50 = vld [vmem:[#allocation3 + $0x1e] sm:$0x1] }
 0x229   :  { %v570_v11 = vadd.f32 %v562_v58, %v528_v42  ;;  %v571_v12 = vadd.f32 %v563_v59, %v529_v43  ;;  %v589_v13 = vrot.slane %v1073_v53, 3  ;;  %v590_v14 = vrot.slane %v1073_v53, 4 }
 0x22a   :  { %v591_v15 = vrot.slane %v1073_v53, 5  ;;  %v592_v17 = vrot.slane %v1073_v53, 6  ;;  %v602_v18 = vmul.f32 %v1073_v53, %v576_v63  ;;  %v603_v19 = vmul.f32 %v587_v9, %v577_v1  ;;  %v1089_v22 = vpop.permute.xlu1 %627  ;;  %v540_v63 = vld [vmem:[#allocation3 + $0x33] sm:$0x1]  ;;  %v702_v9 = vld [vmem:[#allocation3 + $0x7] sm:$0x1] }
 0x22b   :  { %v604_v23 = vmul.f32 %v588_v10, %v578_v2  ;;  %v605_v24 = vmul.f32 %v589_v13, %v579_v5  ;;  %v1091_v26 = vmul.f32 %v590_v14, %v580_v8  ;;  %v629_v30 = vrot.slane %v1089_v22, 1  ;;  %v541_v5 = vld [vmem:[#allocation3 + $0x3b] sm:$0x1]  ;;  %v703_v10 = vld [vmem:[#allocation3 + $0xf] sm:$0x1] }
 0x22c   :  { %v610_v31 = vadd.f32 %v602_v18, %v568_v3  ;;  %v611_v32 = vadd.f32 %v603_v19, %v569_v4  ;;  %v630_v33 = vrot.slane %v1089_v22, 2  ;;  %v631_v34 = vrot.slane %v1089_v22, 3 }
 0x22d   :  { %v612_v38 = vadd.f32 %v604_v23, %v570_v11  ;;  %v1096_v39 = vadd.f32 %v605_v24, %v571_v12  ;;  %v632_v40 = vrot.slane %v1089_v22, 4  ;;  %v633_v41 = vrot.slane %v1089_v22, 5  ;;  %v704_v11 = vld [vmem:[#allocation3 + $0x17] sm:$0x1] }
 0x22e   :  { %v644_v42 = vmul.f32 %v1089_v22, %v618_v20  ;;  %v645_v43 = vmul.f32 %v629_v30, %v619_v21  ;;  %v646_v45 = vmul.f32 %v630_v33, %v620_v27  ;;  %v1101_v46 = vmul.f32 %v631_v34, %v621_v29  ;;  %v705_v20 = vld [vmem:[#allocation3 + $0x1f] sm:$0x1]  ;;  %v706_v21 = vld [vmem:[#allocation3 + $0x27] sm:$0x1]  ;;  %v581_v27 = vld [vmem:[#allocation3 + $0x2c] sm:$0x1] }
 0x22f   :  { %v1103_v0 = vpop.permute.xlu1 %669  ;;  %v490_v56 = vadd.f32 %v1040_v51, %v1046_v6  ;;  %v491_v57 = vadd.f32 %v1042_v52, %v1048_v7  ;;  %v525_v58 = vmul.f32 %v509_v28, %v499_v37  ;;  %v531_v59 = vadd.f32 %v1062_v35, %v1050_v16 }
 0x230   :  { %v671_v1 = vrot.slane %v1103_v0, 1  ;;  %v672_v2 = vrot.slane %v1103_v0, 2  ;;  %v673_v3 = vrot.slane %v1103_v0, 3  ;;  %v674_v4 = vrot.slane %v1103_v0, 4 }
 0x231   :  { %v686_v51 = vmul.f32 %v1103_v0, %v660_v47  ;;  %v652_v6 = vadd.f32 %v644_v42, %v610_v31  ;;  %v653_v52 = vadd.f32 %v645_v43, %v611_v32  ;;  %v654_v7 = vadd.f32 %v646_v45, %v612_v38  ;;  %v583_v38 = vld [vmem:[#allocation3 + $0x3c] sm:$0x1]  ;;  %v622_v42 = vld [vmem:[#allocation3 + $0x25] sm:$0x1] }
 0x232   :  { %v687_v60 = vmul.f32 %v671_v1, %v661_v48  ;;  %v688_v28 = vmul.f32 %v672_v2, %v662_v49  ;;  %v1118_v8 = vmul.f32 %v673_v3, %v663_v50  ;;  %v532_v16 = vadd.f32 %v1064_v36, %v490_v56  ;;  %v623_v49 = vld [vmem:[#allocation3 + $0x2d] sm:$0x1]  ;;  %v624_v50 = vld [vmem:[#allocation3 + $0x35] sm:$0x1] }
 0x233   :  { %v694_v35 = vadd.f32 %v686_v51, %v652_v6  ;;  %v533_v12 = vadd.f32 %v525_v58, %v491_v57  ;;  %v566_v13 = vmul.f32 %v550_v54, %v540_v63  ;;  %v567_v14 = vmul.f32 %v551_v55, %v541_v5  ;;  %v582_v55 = vld [vmem:[#allocation3 + $0x34] sm:$0x1]  ;;  %v664_v6 = vld [vmem:[#allocation3 + $0x26] sm:$0x1] }
 0x234   :  { %v695_v18 = vadd.f32 %v687_v60, %v653_v52  ;;  %v696_v19 = vadd.f32 %v688_v28, %v654_v7  ;;  %v1125_v23 = vpop.permute.xlu1 %711  ;;  %v572_v36 = vadd.f32 %v1078_v61, %v1067_v44  ;;  %v573_v24 = vadd.f32 %v1080_v62, %v531_v59  ;;  %v625_v59 = vld [vmem:[#allocation3 + $0x3d] sm:$0x1]  ;;  %v665_v52 = vld [vmem:[#allocation3 + $0x2e] sm:$0x1]  ;;  %v666_v28 = vld [vmem:[#allocation3 + $0x36] sm:$0x1] }
 0x235   :  { %v713_v29 = vrot.slane %v1125_v23, 1  ;;  %v714_v30 = vrot.slane %v1125_v23, 2  ;;  %v715_v54 = vrot.slane %v1125_v23, 3  ;;  %v716_v25 = vrot.slane %v1125_v23, 4 }
 0x236   :  { %v717_v31 = vrot.slane %v1125_v23, 5  ;;  %v728_v32 = vmul.f32 %v1125_v23, %v702_v9  ;;  %v574_v33 = vadd.f32 %v566_v13, %v532_v16  ;;  %v575_v34 = vadd.f32 %v567_v14, %v533_v12  ;;  %v707_v12 = vld [vmem:[#allocation3 + $0x2f] sm:$0x1] }
 0x237   :  { %v729_v37 = vmul.f32 %v713_v29, %v703_v10  ;;  %v730_v44 = vmul.f32 %v714_v30, %v704_v11  ;;  %v731_v61 = vmul.f32 %v715_v54, %v705_v20  ;;  %v732_v62 = vmul.f32 %v716_v25, %v706_v21  ;;  %v667_v11 = vld [vmem:[#allocation3 + $0x3e] sm:$0x1] }
 0x238   :  { %v736_v43 = vadd.f32 %v728_v32, %v694_v35  ;;  %v593_v45 = vrot.slane %v1073_v53, 7  ;;  %v607_v47 = vmul.f32 %v591_v15, %v581_v27  ;;  %v608_v48 = vmul.f32 %v592_v17, %v582_v55 }
 0x239   :  { %v737_v56 = vadd.f32 %v729_v37, %v695_v18  ;;  %v738_v57 = vadd.f32 %v730_v44, %v696_v19  ;;  %v614_v58 = vadd.f32 %v1091_v26, %v572_v36  ;;  %v634_v63 = vrot.slane %v1089_v22, 6  ;;  %v708_v18 = vld [vmem:[#allocation3 + $0x37] sm:$0x1]  ;;  %v709_v19 = vld [vmem:[#allocation3 + $0x3f] sm:$0x1] }
 0x23a   :  { %v609_v1 = vmul.f32 %v593_v45, %v583_v38  ;;  %v615_v2 = vadd.f32 %v607_v47, %v573_v24  ;;  %v616_v3 = vadd.f32 %v608_v48, %v574_v33  ;;  %v635_v5 = vrot.slane %v1089_v22, 7 }
 0x23b   :  { %v752_v51 = vrot.slane %v737_v56, 7  ;;  %v648_v15 = vmul.f32 %v632_v40, %v622_v42  ;;  %v649_v53 = vmul.f32 %v633_v41, %v623_v49  ;;  %v650_v17 = vmul.f32 %v634_v63, %v624_v50 }
 0x23c   :  { %v617_v7 = vadd.f32 %v609_v1, %v575_v34  ;;  %v651_v26 = vmul.f32 %v635_v5, %v625_v59  ;;  %v655_v60 = vadd.f32 %v1101_v46, %v1096_v39  ;;  %v675_v16 = vrot.slane %v1103_v0, 5 }
 0x23d   :  { %v656_v35 = vadd.f32 %v648_v15, %v614_v58  ;;  %v657_v9 = vadd.f32 %v649_v53, %v615_v2  ;;  %v658_v10 = vadd.f32 %v650_v17, %v616_v3  ;;  %v676_v40 = vrot.slane %v1103_v0, 6 }
 0x23e   :  { %v659_v22 = vadd.f32 %v651_v26, %v617_v7  ;;  %v677_v41 = vrot.slane %v1103_v0, 7  ;;  %v690_v13 = vmul.f32 %v674_v4, %v664_v6  ;;  %v691_v14 = vmul.f32 %v675_v16, %v665_v52 }
 0x23f   :  { %v692_v39 = vmul.f32 %v676_v40, %v666_v28  ;;  %v697_v46 = vadd.f32 %v1118_v8, %v655_v60  ;;  %v718_v20 = vrot.slane %v1125_v23, 6  ;;  %v719_v21 = vrot.slane %v1125_v23, 7 }
 0x240   :  { %v693_v36 = vmul.f32 %v677_v41, %v667_v11  ;;  %v698_v24 = vadd.f32 %v690_v13, %v656_v35  ;;  %v699_v27 = vadd.f32 %v691_v14, %v657_v9  ;;  %v733_v29 = vmul.f32 %v717_v31, %v707_v12 }
 0x241   :  { %v700_v30 = vadd.f32 %v692_v39, %v658_v10  ;;  %v734_v54 = vmul.f32 %v718_v20, %v708_v18  ;;  %v735_v25 = vmul.f32 %v719_v21, %v709_v19  ;;  %v739_v55 = vadd.f32 %v731_v61, %v697_v46 }
 0x242   :  { %v701_v0 = vadd.f32 %v693_v36, %v659_v22  ;;  %v740_v4 = vadd.f32 %v732_v62, %v698_v24  ;;  %v741_v32 = vadd.f32 %v733_v29, %v699_v27  ;;  %v753_v33 = vsel %vm61_vm0, %v752_v51, %v736_v43 }
 0x243   :  { %v742_v34 = vadd.f32 %v734_v54, %v700_v30  ;;  %v754_v37 = vrot.slane %v738_v57, 6  ;;  %v756_v44 = vrot.slane %v739_v55, 5 }
 0x244   :  { %v743_v8 = vadd.f32 %v735_v25, %v701_v0  ;;  %v758_v23 = vrot.slane %v740_v4, 4  ;;  %v760_v45 = vrot.slane %v741_v32, 3 }
 0x245   :  { %v755_v38 = vsel %vm64_vm1, %v754_v37, %v753_v33  ;;  %v762_v61 = vrot.slane %v742_v34, 2 }
 0x246   :  { %v757_v42 = vsel %vm67_vm2, %v756_v44, %v755_v38  ;;  %v764_v47 = vrot.slane %v743_v8, 1 }
 0x247   :  { %v759_v31 = vsel %vm70_vm3, %v758_v23, %v757_v42 }
 0x248   :  { %v761_v62 = vsel %vm73_vm4, %v760_v45, %v759_v31 }
 0x249   :  { %v763_v43 = vsel %vm76_vm5, %v762_v61, %v761_v62 }
 0x24a   :  { %v765_v48 = vsel %vm79_vm6, %v764_v47, %v763_v43 }
 0x24b   :  { %767 = vst.msk [vmem:[#allocation6] sm:$0xff] %vm82_vm7, %v765_v48 }
 0x24c   :  { %845 = shalt.err (!%p842_p12)
}
 0x24d   :  { %s846_s5 = scalar_lea.hbm %s1181_s3, 128 }
 0x24e   :  { %p847_p13 = scmp.ne.s32.totalorder %s1181_s3, %s846_s5  ;;  %p850_p0 = scmp.lt.u32.totalorder %s846_s5, %s1181_s3 }
 0x250   :  { %p852_p1 = pnand %p850_p0, %p847_p13 }
 0x252   :  { %855 = shalt.err (!%p852_p1)
}
 0x253   :  { %777 = dma.vmem_to_hbm [thread:$0]  %s775_s28, 128, %s1181_s3, [#allocation5]  }
 0x254   :  { %858 = dma.done.wait [#allocation5], 128  }
 0x255   :  { %859 = vsyncadd [#allocation5], 4294967168 }
 0x256   :  { %781 = vsyncpa [#allocation4], 1 }
 0x257   :  { %782 = vsyncpa [#allocation5], 1 }

</bundles_post_ra>
